<compile_context>
chip_gen: v5e
topology: v5e:2x2
jax: 0.10.0
libtpu: 0.0.40
codegen_flags: <defaults>
</compile_context>

<pallas_src>
import functools
import math

import jax
import jax.numpy as jnp
from jax.experimental import pallas as pl
from jax.experimental.pallas import tpu as pltpu


def _round_up(x: int, m: int) -> int:
    return ((x + m - 1) // m) * m


# ---- fused sincos core (shared range reduction, VPU-only) -------------------

_TWO_OVER_PI = 0.6366197723675814
# pi/2 split (SLEEF PI_{A,B,C}2f / 2).  HI has 15 significant bits, so k*HI is
# exact (no FMA needed) for |k| < 512, i.e. |arg| < ~800.
_PIO2_HI = 1.57073974609375
_PIO2_MID = 5.657970905303955078125e-05
_PIO2_LO = 9.920936294705029468e-10

# Minimax coefficients on [-pi/4, pi/4] (cephes sinf/cosf single precision).
_S1 = -1.6666654611e-1
_S2 = 8.3321608736e-3
_S3 = -1.9515295891e-4
_C1 = 4.166664568298827e-2
_C2 = -1.388731625493765e-3
_C3 = 2.443315711809948e-5


def _sincos_core(t):
    """Shared reduction: t = k*(pi/2) + r, |r| <= pi/4.

    Returns (sin_r, cos_r, k_int32)."""
    k = jnp.floor(t * _TWO_OVER_PI + 0.5)
    r = t - k * _PIO2_HI
    r = r - k * _PIO2_MID
    r = r - k * _PIO2_LO
    z = r * r
    sin_r = ((_S3 * z + _S2) * z + _S1) * z * r + r
    cos_r = ((_C3 * z + _C2) * z + _C1) * z * z - 0.5 * z + 1.0
    return sin_r, cos_r, k.astype(jnp.int32)


def _select_quadrant(sin_r, cos_r, q):
    """sin(k*pi/2 + r) given quadrant q = k mod 4 (q&1 picks poly, q&2 sign)."""
    val = jnp.where((q & 1) == 1, cos_r, sin_r)
    return jnp.where((q & 2) == 2, -val, val)


# ---- kernels -----------------------------------------------------------------


def _kernel_aligned(x_ref, freqs_ref, out_ref, *, half, scale):
    # x_ref: (tile, 1) f32; freqs_ref: (1, half) f32; out_ref: (tile, 2*half).
    # half % 128 == 0: both half-width stores are unmasked; one reduction feeds
    # both the sin and the cos output halves.
    xs = x_ref[...]
    if scale != 1.0:
        xs = xs * scale
    t = xs * freqs_ref[...]                       # (tile, half) broadcast outer product (VPU)
    sin_r, cos_r, k = _sincos_core(t)
    q_sin = k & 3
    q_cos = (k + 1) & 3                           # cos(t) == sin(t + pi/2): exact quadrant shift
    out_ref[:, :half] = _select_quadrant(sin_r, cos_r, q_sin).astype(out_ref.dtype)
    out_ref[:, half:] = _select_quadrant(sin_r, cos_r, q_cos).astype(out_ref.dtype)


def _kernel_fused(x_ref, freqs2_ref, out_ref, *, half, scale):
    # x_ref: (tile, 1) f32; freqs2_ref: (1, size) = [freqs | freqs]; out_ref: (tile, size).
    # half < 128: compute the whole lane width at once and emit ONE lane-dense store.
    xs = x_ref[...]
    if scale != 1.0:
        xs = xs * scale
    t = xs * freqs2_ref[...]                      # (tile, size)
    sin_r, cos_r, k = _sincos_core(t)
    lane = jax.lax.broadcasted_iota(jnp.int32, t.shape, 1)
    q = (k + jnp.where(lane >= half, 1, 0)) & 3   # cos lanes use quadrant k+1 (exact identity)
    out_ref[...] = _select_quadrant(sin_r, cos_r, q).astype(out_ref.dtype)


# ---- wrapper -------------------------------------------------------------------


def sinusoidal_embedding(
    x: jax.Array,
    size: int,
    scale: float = 1.0,
    *,
    tile_n: int | None = None,
    out_dtype=jnp.float32,
    vmem_budget_bytes: int = 12 * 1024 * 1024,
) -> jax.Array:
    """Pallas implementation of SinusoidalEmbedding.forward.

    Args:
      x: positions, any shape (flattened internally), any float dtype.
      size: embedding size (output last dim). Must be even and >= 4.
      scale: static multiplicative scale applied to x before the outer product.
      tile_n: rows per grid step (multiple of 8). None -> auto from VMEM budget.
      out_dtype: float32 matches the PyTorch module; bfloat16 is an opt-in perf
        win (halves HBM writeback on v5e, doubles usable tile on v7x).
      vmem_budget_bytes: double-buffered VMEM budget used to derive the tile.

    Returns:
      (*x.shape, size) embedding, [sin | cos] along the last axis.
    """
    assert size % 2 == 0, "size must be even (sin/cos halves)"
    assert size >= 4, "size must be >= 4 (half - 1 > 0 in the frequency table)"

    orig_shape = x.shape
    xf = x.reshape(-1).astype(jnp.float32)
    n = xf.shape[0]
    half = size // 2

    # Parameter-free module; frequency table is a tiny trace-time constant.
    freqs = jnp.exp(
        jnp.arange(half, dtype=jnp.float32) * (-(math.log(10000.0) / (half - 1)))
    )

    lane_aligned = (half % 128 == 0)
    if lane_aligned:
        freq_in = freqs.reshape(1, half)
        freq_block = (1, half)
        kernel = functools.partial(_kernel_aligned, half=half, scale=float(scale))
    else:
        freq_in = jnp.concatenate([freqs, freqs]).reshape(1, size)
        freq_block = (1, size)
        kernel = functools.partial(_kernel_fused, half=half, scale=float(scale))

    # Row tile: multiple of 8 sublanes, sized to the VMEM budget.
    # Per row, double-buffered: size*out_bytes (output tile) + 512 B (lane-padded
    # (tile,1) x column).  The (1, size) freq row double buffer is negligible.
    out_bytes = jnp.dtype(out_dtype).itemsize
    n_pad = _round_up(max(n, 1), 8)
    if tile_n is None:
        per_row = 2 * (size * out_bytes + 512)
        tile = (vmem_budget_bytes // per_row) // 8 * 8
        tile = max(8, min(tile, n_pad))
    else:
        tile = max(8, min(_round_up(int(tile_n), 8), n_pad))
    grid = (pl.cdiv(n, tile),)

    # Hand-rolled sincos is pure VPU work (~30 vector ops / output element).
    cost = pl.CostEstimate(
        flops=30 * n * size,
        transcendentals=0,
        bytes_accessed=n * 4 + size * 4 + n * size * out_bytes,
    )

    out = pl.pallas_call(
        kernel,
        out_shape=jax.ShapeDtypeStruct((n, size), out_dtype),
        grid=grid,
        in_specs=[
            # x column: (tile, 1). Lane-pads to (tile, 128) in VMEM (512 B/row),
            # accounted for in the tile budget above.
            pl.BlockSpec((tile, 1), lambda i: (i, 0)),
            # Frequency row: same tiny block every grid step (no re-DMA).
            pl.BlockSpec(freq_block, lambda i: (0, 0)),
        ],
        out_specs=pl.BlockSpec((tile, size), lambda i: (i, 0)),
        compiler_params=pltpu.CompilerParams(
            dimension_semantics=("parallel",),
        ),
        cost_estimate=cost,
    )(xf.reshape(n, 1), freq_in)

    return out.reshape(orig_shape + (size,))


# ---- reference & self-test -----------------------------------------------------


def _reference(x, size, scale=1.0):
    xf = x.astype(jnp.float32) * scale
    half = size // 2
    freqs = jnp.exp(
        jnp.arange(half, dtype=jnp.float32) * (-(math.log(10000.0) / (half - 1)))
    )
    emb = xf[..., None] * freqs
    return jnp.concatenate([jnp.sin(emb), jnp.cos(emb)], axis=-1)


if __name__ == "__main__":
    key = jax.random.PRNGKey(0)

    # Case 1: tiny shape, size=32 (half=16 < 128) -> fused single-store path.
    x1 = jax.random.normal(key, (8,), dtype=jnp.float32) * 10.0
    out1 = jax.block_until_ready(sinusoidal_embedding(x1, 32, 1.0))
    ref1 = _reference(x1, 32, 1.0)
    assert out1.shape == (8, 32), out1.shape
    assert jnp.allclose(out1, ref1, atol=1e-5, rtol=1e-5), "mismatch (case 1)"

    # Case 2: multi-tile grid, ragged last block, half=128 -> aligned two-store
    # path, non-unit scale.  |arg| reaches ~90 here; the kernel's sincos and
    # XLA's sin/cos range-reduce independently (argument ulp ~8e-6), so allow a
    # slightly wider absolute tolerance.
    x2 = jax.random.normal(jax.random.PRNGKey(1), (300,), dtype=jnp.float32)
    out2 = jax.block_until_ready(sinusoidal_embedding(x2, 256, 25.0, tile_n=128))
    ref2 = _reference(x2, 256, 25.0)
    assert out2.shape == (300, 256), out2.shape
    assert jnp.allclose(out2, ref2, atol=2e-5, rtol=1e-5), "mismatch (case 2)"

    # Case 3: 2-D input, size=128 (half=64) -> fused path, one unmasked
    # 128-lane-dense store instead of two masked 64-lane stores.
    x3 = jax.random.normal(jax.random.PRNGKey(2), (2, 8), dtype=jnp.float32) * 5.0
    out3 = jax.block_until_ready(sinusoidal_embedding(x3, 128, 1.0))
    ref3 = _reference(x3, 128, 1.0)
    assert out3.shape == (2, 8, 128), out3.shape
    assert jnp.allclose(out3, ref3, atol=1e-5, rtol=1e-5), "mismatch (case 3)"

    print("KERNEL_OK")
</pallas_src>

<mosaic_0001>
module attributes {stable_mosaic.version = 11 : i64} {
  func.func @_kernel_fused(%arg0: i32, %arg1: memref<8x1xf32, #tpu.memory_space<vmem>>, %arg2: memref<1x32xf32, #tpu.memory_space<vmem>>, %arg3: memref<8x32xf32, #tpu.memory_space<vmem>>) attributes {dimension_semantics = [#tpu.dimension_semantics<parallel>], iteration_bounds = array<i64: 1>, scalar_prefetch = 0 : i64, scratch_operands = 0 : i64, tpu.core_type = #tpu.core_type<tc>, window_params = [{transform_indices = @transform_0, window_bounds = array<i64: 8, 1>}, {pipeline_mode = #tpu.pipeline_mode<synchronous>, transform_indices = @transform_1, window_bounds = array<i64: 1, 32>}, {transform_indices = @transform_2, window_bounds = array<i64: 8, 32>}]} {
    %c0 = arith.constant 0 : index
    %c0_0 = arith.constant 0 : index
    %0 = vector.load %arg1[%c0, %c0_0] : memref<8x1xf32, #tpu.memory_space<vmem>>, vector<8x1xf32>
    %c0_1 = arith.constant 0 : index
    %c0_2 = arith.constant 0 : index
    %1 = vector.load %arg2[%c0_1, %c0_2] : memref<1x32xf32, #tpu.memory_space<vmem>>, vector<1x32xf32>
    %2 = vector.broadcast %0 : vector<8x1xf32> to vector<8x32xf32>
    %3 = vector.broadcast %1 : vector<1x32xf32> to vector<8x32xf32>
    %4 = arith.mulf %2, %3 : vector<8x32xf32>
    %cst = arith.constant 0.636619746 : f32
    %5 = vector.broadcast %cst : f32 to vector<8x32xf32>
    %6 = arith.mulf %4, %5 : vector<8x32xf32>
    %cst_3 = arith.constant 5.000000e-01 : f32
    %7 = vector.broadcast %cst_3 : f32 to vector<8x32xf32>
    %8 = arith.addf %6, %7 : vector<8x32xf32>
    %9 = math.floor %8 : vector<8x32xf32>
    %cst_4 = arith.constant 1.57073975 : f32
    %10 = vector.broadcast %cst_4 : f32 to vector<8x32xf32>
    %11 = arith.mulf %9, %10 : vector<8x32xf32>
    %12 = arith.subf %4, %11 : vector<8x32xf32>
    %cst_5 = arith.constant 5.65797091E-5 : f32
    %13 = vector.broadcast %cst_5 : f32 to vector<8x32xf32>
    %14 = arith.mulf %9, %13 : vector<8x32xf32>
    %15 = arith.subf %12, %14 : vector<8x32xf32>
    %cst_6 = arith.constant 9.92093629E-10 : f32
    %16 = vector.broadcast %cst_6 : f32 to vector<8x32xf32>
    %17 = arith.mulf %9, %16 : vector<8x32xf32>
    %18 = arith.subf %15, %17 : vector<8x32xf32>
    %19 = arith.mulf %18, %18 : vector<8x32xf32>
    %cst_7 = arith.constant -1.95152956E-4 : f32
    %20 = vector.broadcast %cst_7 : f32 to vector<8x32xf32>
    %21 = arith.mulf %20, %19 : vector<8x32xf32>
    %cst_8 = arith.constant 0.00833216123 : f32
    %22 = vector.broadcast %cst_8 : f32 to vector<8x32xf32>
    %23 = arith.addf %21, %22 : vector<8x32xf32>
    %24 = arith.mulf %23, %19 : vector<8x32xf32>
    %cst_9 = arith.constant -0.166666552 : f32
    %25 = vector.broadcast %cst_9 : f32 to vector<8x32xf32>
    %26 = arith.addf %24, %25 : vector<8x32xf32>
    %27 = arith.mulf %26, %19 : vector<8x32xf32>
    %28 = arith.mulf %27, %18 : vector<8x32xf32>
    %29 = arith.addf %28, %18 : vector<8x32xf32>
    %cst_10 = arith.constant 2.44331568E-5 : f32
    %30 = vector.broadcast %cst_10 : f32 to vector<8x32xf32>
    %31 = arith.mulf %30, %19 : vector<8x32xf32>
    %cst_11 = arith.constant -0.00138873165 : f32
    %32 = vector.broadcast %cst_11 : f32 to vector<8x32xf32>
    %33 = arith.addf %31, %32 : vector<8x32xf32>
    %34 = arith.mulf %33, %19 : vector<8x32xf32>
    %cst_12 = arith.constant 0.0416666456 : f32
    %35 = vector.broadcast %cst_12 : f32 to vector<8x32xf32>
    %36 = arith.addf %34, %35 : vector<8x32xf32>
    %37 = arith.mulf %36, %19 : vector<8x32xf32>
    %38 = arith.mulf %37, %19 : vector<8x32xf32>
    %cst_13 = arith.constant 5.000000e-01 : f32
    %39 = vector.broadcast %cst_13 : f32 to vector<8x32xf32>
    %40 = arith.mulf %39, %19 : vector<8x32xf32>
    %41 = arith.subf %38, %40 : vector<8x32xf32>
    %cst_14 = arith.constant 1.000000e+00 : f32
    %42 = vector.broadcast %cst_14 : f32 to vector<8x32xf32>
    %43 = arith.addf %41, %42 : vector<8x32xf32>
    %44 = arith.fptosi %9 : vector<8x32xf32> to vector<8x32xi32>
    %45 = tpu.iota {dimensions = array<i32: 1>} : vector<8x32xi32>
    %c16_i32 = arith.constant 16 : i32
    %46 = vector.broadcast %c16_i32 : i32 to vector<8x32xi32>
    %47 = arith.cmpi sge, %45, %46 : vector<8x32xi32>
    %c1_i32 = arith.constant 1 : i32
    %c0_i32 = arith.constant 0 : i32
    %48 = vector.broadcast %c1_i32 : i32 to vector<8x32xi32>
    %49 = vector.broadcast %c0_i32 : i32 to vector<8x32xi32>
    %50 = arith.select %47, %48, %49 : vector<8x32xi1>, vector<8x32xi32>
    %51 = arith.addi %44, %50 : vector<8x32xi32>
    %c3_i32 = arith.constant 3 : i32
    %52 = vector.broadcast %c3_i32 : i32 to vector<8x32xi32>
    %53 = arith.andi %51, %52 : vector<8x32xi32>
    %c1_i32_15 = arith.constant 1 : i32
    %54 = vector.broadcast %c1_i32_15 : i32 to vector<8x32xi32>
    %55 = arith.andi %53, %54 : vector<8x32xi32>
    %c1_i32_16 = arith.constant 1 : i32
    %56 = vector.broadcast %c1_i32_16 : i32 to vector<8x32xi32>
    %57 = arith.cmpi eq, %55, %56 : vector<8x32xi32>
    %58 = arith.select %57, %43, %29 : vector<8x32xi1>, vector<8x32xf32>
    %c2_i32 = arith.constant 2 : i32
    %59 = vector.broadcast %c2_i32 : i32 to vector<8x32xi32>
    %60 = arith.andi %53, %59 : vector<8x32xi32>
    %c2_i32_17 = arith.constant 2 : i32
    %61 = vector.broadcast %c2_i32_17 : i32 to vector<8x32xi32>
    %62 = arith.cmpi eq, %60, %61 : vector<8x32xi32>
    %cst_18 = arith.constant 0.000000e+00 : f32
    %63 = vector.broadcast %cst_18 : f32 to vector<8x32xf32>
    %64 = arith.subf %63, %58 : vector<8x32xf32>
    %65 = arith.select %62, %64, %58 : vector<8x32xi1>, vector<8x32xf32>
    %c0_19 = arith.constant 0 : index
    %c0_20 = arith.constant 0 : index
    %66 = vector.load %arg3[%c0_19, %c0_20] : memref<8x32xf32, #tpu.memory_space<vmem>>, vector<8x32xf32>
    tpu.vector_store %arg3[%c0_19, %c0_20], %65 {strides = array<i32>} : memref<8x32xf32, #tpu.memory_space<vmem>>, vector<8x32xf32>,
    return
  }
  func.func @transform_0(%arg0: i32) -> (i32, i32) {
    %c0_i32 = arith.constant 0 : i32
    %c0_i32_0 = arith.constant 0 : i32
    return %arg0, %c0_i32 : i32, i32
  }
  func.func @transform_1(%arg0: i32) -> (i32, i32) {
    %c0_i32 = arith.constant 0 : i32
    %c0_i32_0 = arith.constant 0 : i32
    %c0_i32_1 = arith.constant 0 : i32
    return %c0_i32, %c0_i32_0 : i32, i32
  }
  func.func @transform_2(%arg0: i32) -> (i32, i32) {
    %c0_i32 = arith.constant 0 : i32
    %c0_i32_0 = arith.constant 0 : i32
    return %arg0, %c0_i32 : i32, i32
  }
}

</mosaic_0001>

<bundles_post_ra>
// kernel: tpu_custom_call.1
= control target key start
LH: loop header
LB: loop body
LE: loop exit
PB: predicated region body
PF: predicated region fallthrough
CT: control target
= control target key end

     0   :  { %v113_v1 = vmov 0   ;;  %s139_s0 = inlined_call_operand.vmem [shape: f32[8,1], index: 0, kind: input, shape index: {}]   ;;  %s140_s1 = inlined_call_operand.vmem [shape: f32[1,32], index: 1, kind: input, shape index: {}]   ;;  %s141_s2 = inlined_call_operand.hbm [shape: f32[8,32], index: 2, kind: output, shape index: {}]  }
   0x1   :  { %v12_v0 = vld [vmem:[%s139_s0] sm:$0xff]  ;;  %85 = vset.pattern.permute.xlu0 %v113_v1 }
   0x2   :  { %7 = vsyncpa [#allocation3], 0  ;;  %16 = vperm.xlu0 %85, %v12_v0   ;;  %v86_v2 = vld [vmem:[%s140_s1] ss:$0 sm:$0xff]  ;;  %v50_v8 = vlaneseq  ;;  %s114_s0 = smov [#allocation2]   ;;  %s72_s15 = sshll.u32 %s141_s2, 4  ;;  %s73_s15 = int_to_ptr.hbm [resolvable:$true] %s72_s15 }
   0x3   :  { %s70_s1 = sshll.u32 %s114_s0, 4  ;;  %vm63_vm2 = vcmask 261120   ;;  %s71_s1 = int_to_ptr.vmem [resolvable:$true] %s70_s1 }
   0x4   :  { %v51_v12 = vand.u32 127, %v50_v8 }
   0x6   :  { %vm52_vm0 = vcmp.ge.s32.totalorder %v51_v12, 16 }
   0x7   :  { %v53_v18 = vsel %vm52_vm0, 1, %v113_v1 }
  0x74   :  { %v17_v3 = vpop.permute.xlu0 %16 }
  0x75   :  { %v22_v4 = vmul.f32 %v86_v2, %v17_v3 }
  0x77   :  { %v23_v5 = vmul.f32 0.63661975, %v22_v4 }
  0x79   :  { %v24_v6 = vadd.f32 0.5, %v23_v5 }
  0x7b   :  { %v25_v7 = vfloor.f32 %v24_v6 }
  0x7d   :  { %v26_v9 = vmul.f32 1.5707397, %v25_v7  ;;  %v28_v11 = vmul.f32 5.657971e-05, %v25_v7  ;;  %v30_v14 = vmul.f32 9.920936e-10, %v25_v7  ;;  %v82_v17 = vcvt.f32.s32 %v25_v7 }
  0x7f   :  { %v27_v10 = vsub.f32 %v22_v4, %v26_v9  ;;  %v54_v23 = vadd.s32 %v82_v17, %v53_v18 }
  0x81   :  { %v29_v13 = vsub.f32 %v27_v10, %v28_v11  ;;  %v55_v28 = vand.u32 3, %v54_v23 }
  0x83   :  { %v31_v15 = vsub.f32 %v29_v13, %v30_v14  ;;  %v56_v34 = vand.u32 1, %v55_v28  ;;  %v59_v38 = vand.u32 2, %v55_v28 }
  0x85   :  { %v32_v16 = vmul.f32 %v31_v15, %v31_v15  ;;  %vm57_vm1 = vcmp.eq.s32.totalorder %v56_v34, 1  ;;  %vm60_vm3 = vcmp.eq.s32.totalorder %v59_v38, 2 }
  0x87   :  { %v33_v19 = vmul.f32 -0.00019515296, %v32_v16  ;;  %v40_v20 = vmul.f32 2.4433157e-05, %v32_v16  ;;  %v46_v33 = vmul.f32 0.5, %v32_v16 }
  0x89   :  { %v34_v21 = vadd.f32 0.008332161, %v33_v19  ;;  %v41_v22 = vadd.f32 -0.0013887316, %v40_v20 }
  0x8b   :  { %v35_v24 = vmul.f32 %v34_v21, %v32_v16  ;;  %v42_v25 = vmul.f32 %v41_v22, %v32_v16 }
  0x8d   :  { %v36_v26 = vadd.f32 -0.16666655, %v35_v24  ;;  %v43_v27 = vadd.f32 0.041666646, %v42_v25 }
  0x8f   :  { %v37_v29 = vmul.f32 %v36_v26, %v32_v16  ;;  %v44_v30 = vmul.f32 %v43_v27, %v32_v16 }
  0x91   :  { %v38_v31 = vmul.f32 %v37_v29, %v31_v15  ;;  %v45_v32 = vmul.f32 %v44_v30, %v32_v16 }
  0x93   :  { %v47_v35 = vsub.f32 %v45_v32, %v46_v33  ;;  %v39_v36 = vadd.f32 %v38_v31, %v31_v15 }
  0x95   :  { %v48_v37 = vadd.f32 1.0, %v47_v35 }
  0x97   :  { %v58_v39 = vsel %vm57_vm1, %v48_v37, %v39_v36 }
  0x98   :  { %v61_v40 = vsub.f32 0.0, %v58_v39 }
  0x9a   :  { %v62_v41 = vsel %vm60_vm3, %v61_v40, %v58_v39 }
  0x9b   :  { %64 = vst.msk [vmem:[#allocation2] sm:$0xff] %vm63_vm2, %v62_v41 }
  0x9c   :  { %75 = dma.vmem_to_hbm [thread:$0]  %s71_s1, 128, %s73_s15, [#allocation3]  }
  0x9d   :  { %111 = dma.done.wait [#allocation3], 128  }
  0x9e   :  { %112 = vsyncadd [#allocation3], 4294967168 }
  0x9f   :  { %80 = vsyncpa [#allocation3], 1 }

</bundles_post_ra>
